<compile_context>
chip_gen: v7x
topology: tpu7x:2x2x1
jax: 0.10.0
libtpu: 0.0.40
codegen_flags: <defaults>
</compile_context>

<pallas_src>
import math
import functools

import jax
import jax.numpy as jnp
from jax.experimental import pallas as pl
from jax.experimental.pallas import tpu as pltpu

_BN_EPS = 1e-5


# ------------------------------ Pallas kernel -------------------------------

def _shuffle_unit_kernel(x_ref, mask_ref, w1_ref, b1_ref, w2_ref, b2_ref,
                         w3_ref, b3_ref, o_ref, h1pad_ref, im2col_ref,
                         *, H, W, Cr):
    """One image; x_ref block is (1, Cin, H*W) — channels first, lane-dense."""
    HW = H * W
    PADL = (h1pad_ref.shape[1] - HW) // 2        # lane-aligned safety margin

    # Margins are never written by the taps' source window; zero them so that
    # (garbage * 0) in the mask multiply can't produce NaN.  Two (Cr, 128)
    # stores — negligible (the old version swept the whole padded scratch).
    zeros = jnp.zeros((Cr, PADL), jnp.float32)
    h1pad_ref[:, :PADL] = zeros
    h1pad_ref[:, PADL + HW:] = zeros

    # pointWise1: folded-BN 1x1 conv + ReLU.  bf16 MXU operands, f32
    # accumulation; bias/ReLU epilogue stays f32 (v5e has no bf16 VPU).
    h1 = jnp.dot(w1_ref[...], x_ref[0].astype(jnp.bfloat16),
                 preferred_element_type=jnp.float32)
    h1 = jnp.maximum(h1 + b1_ref[...], 0.0)      # (Cr, HW) f32, lane-dense
    h1pad_ref[:, PADL:PADL + HW] = h1

    # "DWConv" 3x3 conv (+ folded BN) via im2col: nine lane-shifted,
    # boundary-masked copies of h1 stacked to (9*Cr, HW) bf16, then ONE MXU
    # matmul with K = 9*Cr.  Shifts are static-offset reads from the padded
    # h1 buffer (no per-tap reshape copies, no 9 small-K matmuls).
    masks = mask_ref[...]                        # (9, HW) f32 in {0, 1}
    for kh in range(3):
        for kw in range(3):
            t = kh * 3 + kw
            d = (kh - 1) * W + (kw - 1)          # flat source offset
            tap = h1pad_ref[:, PADL + d:PADL + d + HW] * masks[t:t + 1, :]
            im2col_ref[t * Cr:(t + 1) * Cr, :] = tap.astype(jnp.bfloat16)

    h2 = jnp.dot(w2_ref[...], im2col_ref[...],
                 preferred_element_type=jnp.float32) + b2_ref[...]   # (Cr, HW)

    # pointWise2 (+ folded BN), then residual add; output store is lane-dense.
    h3 = jnp.dot(w3_ref[...], h2.astype(jnp.bfloat16),
                 preferred_element_type=jnp.float32) + b3_ref[...]   # (Cin, HW)
    o_ref[0] = x_ref[0] + h3


# ------------------------------- wrapper ------------------------------------

def _fold_bn(w, b, gamma, beta, mean, var):
    """Fold eval-mode BatchNorm into a conv whose OUT channel is the first axis."""
    s = gamma / jnp.sqrt(var + _BN_EPS)
    return w * s[:, None], (b - mean) * s + beta


def shuffle_unit_forward(x, p):
    """x: (B, Cin, H, W) float32 (PyTorch NCHW). Eval-mode ShuffleUnit forward."""
    B, Cin, H, W = x.shape
    Cr = p["w1"].shape[0]
    HW = H * W
    PADL = ((W + 1 + 127) // 128) * 128          # margin >= W+1, lane-aligned

    # Fold BN into channels-first conv weights (trace-time parameter prep).
    w1, b1 = _fold_bn(p["w1"][:, :, 0, 0], p["b1"],
                      p["g1"], p["beta1"], p["m1"], p["v1"])            # (Cr, Cin)
    w2, b2 = _fold_bn(jnp.transpose(p["w2"], (0, 2, 3, 1)).reshape(Cr, 9 * Cr),
                      p["b2"], p["g2"], p["beta2"], p["m2"], p["v2"])   # (Cr, 9*Cr)
    w3, b3 = _fold_bn(p["w3"][:, :, 0, 0], p["b3"],
                      p["g3"], p["beta3"], p["m3"], p["v3"])            # (Cin, Cr)

    # bf16 MXU operands; biases stay f32 column vectors.
    w1, w2, w3 = (w.astype(jnp.bfloat16) for w in (w1, w2, w3))
    b1, b2, b3 = b1[:, None], b2[:, None], b3[:, None]

    # {0,1} validity masks for the nine 3x3 taps (computed once, VMEM-resident).
    rows = jnp.arange(H)[:, None]
    cols = jnp.arange(W)[None, :]
    tap_masks = []
    for kh in range(3):
        for kw in range(3):
            valid = ((rows + kh - 1 >= 0) & (rows + kh - 1 < H) &
                     (cols + kw - 1 >= 0) & (cols + kw - 1 < W))
            tap_masks.append(valid.reshape(HW))
    tap_mask = jnp.stack(tap_masks, axis=0).astype(jnp.float32)         # (9, HW)

    # Channels-first with spatial flattened onto lanes: pure reshape of NCHW.
    x_flat = x.reshape(B, Cin, HW)

    out_flat = pl.pallas_call(
        functools.partial(_shuffle_unit_kernel, H=H, W=W, Cr=Cr),
        out_shape=jax.ShapeDtypeStruct((B, Cin, HW), jnp.float32),
        grid=(B,),
        in_specs=[
            pl.BlockSpec((1, Cin, HW), lambda b: (b, 0, 0)),    # activations
            pl.BlockSpec((9, HW), lambda b: (0, 0)),            # tap masks (resident)
            pl.BlockSpec((Cr, Cin), lambda b: (0, 0)),          # w1 (resident)
            pl.BlockSpec((Cr, 1), lambda b: (0, 0)),            # b1
            pl.BlockSpec((Cr, 9 * Cr), lambda b: (0, 0)),       # w2 (im2col layout)
            pl.BlockSpec((Cr, 1), lambda b: (0, 0)),            # b2
            pl.BlockSpec((Cin, Cr), lambda b: (0, 0)),          # w3
            pl.BlockSpec((Cin, 1), lambda b: (0, 0)),           # b3
        ],
        out_specs=pl.BlockSpec((1, Cin, HW), lambda b: (b, 0, 0)),
        scratch_shapes=[
            pltpu.VMEM((Cr, HW + 2 * PADL), jnp.float32),       # margin-padded h1
            pltpu.VMEM((9 * Cr, HW), jnp.bfloat16),             # im2col slab
        ],
        compiler_params=pltpu.CompilerParams(
            dimension_semantics=("parallel",),
            vmem_limit_bytes=32 * 1024 * 1024),
    )(x_flat, tap_mask, w1, b1, w2, b2, w3, b3)

    return out_flat.reshape(B, Cin, H, W)


# ------------------------------ pure-JAX ref ---------------------------------

def _bn_eval_nchw(x, gamma, beta, mean, var):
    s = gamma / jnp.sqrt(var + _BN_EPS)
    return x * s[None, :, None, None] + (beta - mean * s)[None, :, None, None]


def _conv_nchw(x, w, b, padding):
    y = jax.lax.conv_general_dilated(
        x, w, window_strides=(1, 1),
        padding=[(padding, padding), (padding, padding)],
        dimension_numbers=("NCHW", "OIHW", "NCHW"),
        precision=jax.lax.Precision.HIGHEST)
    return y + b[None, :, None, None]


def shuffle_unit_ref(x, p):
    y = _conv_nchw(x, p["w1"], p["b1"], 0)
    y = jnp.maximum(_bn_eval_nchw(y, p["g1"], p["beta1"], p["m1"], p["v1"]), 0.0)
    y = _conv_nchw(y, p["w2"], p["b2"], 1)
    y = _bn_eval_nchw(y, p["g2"], p["beta2"], p["m2"], p["v2"])
    y = _conv_nchw(y, p["w3"], p["b3"], 0)
    y = _bn_eval_nchw(y, p["g3"], p["beta3"], p["m3"], p["v3"])
    return x + y


# -------------------------------- params -------------------------------------

def init_params(key, Cin, Cr):
    ks = jax.random.split(key, 18)

    def u(k, shape, fan_in):
        bound = 1.0 / math.sqrt(fan_in)
        return jax.random.uniform(k, shape, jnp.float32, -bound, bound)

    p = {
        "w1": u(ks[0], (Cr, Cin, 1, 1), Cin),
        "b1": u(ks[1], (Cr,), Cin),
        "w2": u(ks[2], (Cr, Cr, 3, 3), Cr * 9),
        "b2": u(ks[3], (Cr,), Cr * 9),
        "w3": u(ks[4], (Cin, Cr, 1, 1), Cr),
        "b3": u(ks[5], (Cin,), Cr),
    }
    # Non-trivial eval-mode BatchNorm parameters / running stats so the BN
    # folding path is actually exercised.
    for name, C, off in (("1", Cr, 6), ("2", Cr, 10), ("3", Cin, 14)):
        p["g" + name] = jax.random.uniform(ks[off], (C,), jnp.float32, 0.8, 1.2)
        p["beta" + name] = jax.random.uniform(ks[off + 1], (C,), jnp.float32, -0.1, 0.1)
        p["m" + name] = jax.random.uniform(ks[off + 2], (C,), jnp.float32, -0.1, 0.1)
        p["v" + name] = jax.random.uniform(ks[off + 3], (C,), jnp.float32, 0.5, 1.5)
    return p


if __name__ == "__main__":
    B, CIN, CR, H, W = 2, 32, 16, 16, 16

    key = jax.random.PRNGKey(0)
    kx, kp = jax.random.split(key)
    x = jax.random.normal(kx, (B, CIN, H, W), jnp.float32)
    params = init_params(kp, CIN, CR)

    out = jax.block_until_ready(shuffle_unit_forward(x, params))
    assert out.shape == (B, CIN, H, W)

    ref = shuffle_unit_ref(x, params)
    err = float(jnp.max(jnp.abs(out - ref)))
    # bf16 MXU operands (f32 accumulate) vs f32 HIGHEST reference -> loosen
    # tolerance; a structural bug would show errors O(0.3+).
    assert err < 8e-2, f"max abs error {err}"

    print("KERNEL_OK")
</pallas_src>

<mosaic_0001>
module attributes {stable_mosaic.version = 11 : i64} {
  func.func @_shuffle_unit_kernel(%arg0: i32, %arg1: memref<1x32x256xf32, #tpu.memory_space<vmem>>, %arg2: memref<9x256xf32, #tpu.memory_space<vmem>>, %arg3: memref<16x32xbf16, #tpu.memory_space<vmem>>, %arg4: memref<16x1xf32, #tpu.memory_space<vmem>>, %arg5: memref<16x144xbf16, #tpu.memory_space<vmem>>, %arg6: memref<16x1xf32, #tpu.memory_space<vmem>>, %arg7: memref<32x16xbf16, #tpu.memory_space<vmem>>, %arg8: memref<32x1xf32, #tpu.memory_space<vmem>>, %arg9: memref<1x32x256xf32, #tpu.memory_space<vmem>>, %arg10: memref<16x512xf32, #tpu.memory_space<vmem>>, %arg11: memref<144x256xbf16, #tpu.memory_space<vmem>>) attributes {dimension_semantics = [#tpu.dimension_semantics<parallel>], iteration_bounds = array<i64: 2>, scalar_prefetch = 0 : i64, scratch_operands = 2 : i64, tpu.core_type = #tpu.core_type<tc>, window_params = [{transform_indices = @transform_0, window_bounds = array<i64: 1, 32, 256>}, {pipeline_mode = #tpu.pipeline_mode<synchronous>, transform_indices = @transform_1, window_bounds = array<i64: 9, 256>}, {pipeline_mode = #tpu.pipeline_mode<synchronous>, transform_indices = @transform_2, window_bounds = array<i64: 16, 32>}, {pipeline_mode = #tpu.pipeline_mode<synchronous>, transform_indices = @transform_3, window_bounds = array<i64: 16, 1>}, {pipeline_mode = #tpu.pipeline_mode<synchronous>, transform_indices = @transform_4, window_bounds = array<i64: 16, 144>}, {pipeline_mode = #tpu.pipeline_mode<synchronous>, transform_indices = @transform_5, window_bounds = array<i64: 16, 1>}, {pipeline_mode = #tpu.pipeline_mode<synchronous>, transform_indices = @transform_6, window_bounds = array<i64: 32, 16>}, {pipeline_mode = #tpu.pipeline_mode<synchronous>, transform_indices = @transform_7, window_bounds = array<i64: 32, 1>}, {transform_indices = @transform_8, window_bounds = array<i64: 1, 32, 256>}]} {
    %cst = arith.constant 0.000000e+00 : f32
    %0 = vector.broadcast %cst : f32 to vector<16x128xf32>
    %c0 = arith.constant 0 : index
    %c0_0 = arith.constant 0 : index
    %1 = vector.load %arg10[%c0, %c0_0] : memref<16x512xf32, #tpu.memory_space<vmem>>, vector<16x128xf32>
    tpu.vector_store %arg10[%c0, %c0_0], %0 {strides = array<i32>} : memref<16x512xf32, #tpu.memory_space<vmem>>, vector<16x128xf32>,
    %c0_1 = arith.constant 0 : index
    %c384 = arith.constant 384 : index
    %2 = vector.load %arg10[%c0_1, %c384] : memref<16x512xf32, #tpu.memory_space<vmem>>, vector<16x128xf32>
    tpu.vector_store %arg10[%c0_1, %c384], %0 {strides = array<i32>} : memref<16x512xf32, #tpu.memory_space<vmem>>, vector<16x128xf32>,
    %c0_2 = arith.constant 0 : index
    %c0_3 = arith.constant 0 : index
    %3 = vector.load %arg3[%c0_2, %c0_3] : memref<16x32xbf16, #tpu.memory_space<vmem>>, vector<16x32xbf16>
    %c0_4 = arith.constant 0 : index
    %c0_5 = arith.constant 0 : index
    %c0_6 = arith.constant 0 : index
    %4 = vector.load %arg1[%c0_4, %c0_5, %c0_6] : memref<1x32x256xf32, #tpu.memory_space<vmem>>, vector<1x32x256xf32>
    %5 = vector.shape_cast %4 : vector<1x32x256xf32> to vector<32x256xf32>
    %6 = arith.truncf %5 : vector<32x256xf32> to vector<32x256xbf16>
    %cst_7 = arith.constant dense<0.000000e+00> : vector<16x256xf32>
    %7 = tpu.matmul %3, %6, %cst_7 {dimension_numbers = #tpu.dot_dimension_numbers<[1], [0], [0], [1], [0, 0, 1, 1], [], []>} : vector<16x32xbf16>, vector<32x256xbf16>, vector<16x256xf32> -> vector<16x256xf32>
    %c0_8 = arith.constant 0 : index
    %c0_9 = arith.constant 0 : index
    %8 = vector.load %arg4[%c0_8, %c0_9] : memref<16x1xf32, #tpu.memory_space<vmem>>, vector<16x1xf32>
    %9 = vector.broadcast %8 : vector<16x1xf32> to vector<16x256xf32>
    %10 = arith.addf %7, %9 : vector<16x256xf32>
    %cst_10 = arith.constant 0.000000e+00 : f32
    %11 = vector.broadcast %cst_10 : f32 to vector<16x256xf32>
    %12 = arith.maximumf %10, %11 : vector<16x256xf32>
    %c0_11 = arith.constant 0 : index
    %c128 = arith.constant 128 : index
    %13 = vector.load %arg10[%c0_11, %c128] : memref<16x512xf32, #tpu.memory_space<vmem>>, vector<16x256xf32>
    tpu.vector_store %arg10[%c0_11, %c128], %12 {strides = array<i32>} : memref<16x512xf32, #tpu.memory_space<vmem>>, vector<16x256xf32>,
    %c0_12 = arith.constant 0 : index
    %c0_13 = arith.constant 0 : index
    %14 = vector.load %arg2[%c0_12, %c0_13] : memref<9x256xf32, #tpu.memory_space<vmem>>, vector<9x256xf32>
    %c0_14 = arith.constant 0 : index
    %c111 = arith.constant 111 : index
    %15 = vector.load %arg10[%c0_14, %c111] : memref<16x512xf32, #tpu.memory_space<vmem>>, vector<16x256xf32>
    %16 = vector.extract_strided_slice %14 {offsets = [0, 0], sizes = [1, 256], strides = [1, 1]} : vector<9x256xf32> to vector<1x256xf32>
    %17 = vector.broadcast %16 : vector<1x256xf32> to vector<16x256xf32>
    %18 = arith.mulf %15, %17 : vector<16x256xf32>
    %19 = arith.truncf %18 : vector<16x256xf32> to vector<16x256xbf16>
    %c0_15 = arith.constant 0 : index
    %c0_16 = arith.constant 0 : index
    %20 = vector.load %arg11[%c0_15, %c0_16] : memref<144x256xbf16, #tpu.memory_space<vmem>>, vector<16x256xbf16>
    tpu.vector_store %arg11[%c0_15, %c0_16], %19 {strides = array<i32>} : memref<144x256xbf16, #tpu.memory_space<vmem>>, vector<16x256xbf16>,
    %c0_17 = arith.constant 0 : index
    %c112 = arith.constant 112 : index
    %21 = vector.load %arg10[%c0_17, %c112] : memref<16x512xf32, #tpu.memory_space<vmem>>, vector<16x256xf32>
    %22 = vector.extract_strided_slice %14 {offsets = [1, 0], sizes = [1, 256], strides = [1, 1]} : vector<9x256xf32> to vector<1x256xf32>
    %23 = vector.broadcast %22 : vector<1x256xf32> to vector<16x256xf32>
    %24 = arith.mulf %21, %23 : vector<16x256xf32>
    %25 = arith.truncf %24 : vector<16x256xf32> to vector<16x256xbf16>
    %c16 = arith.constant 16 : index
    %c0_18 = arith.constant 0 : index
    %26 = vector.load %arg11[%c16, %c0_18] : memref<144x256xbf16, #tpu.memory_space<vmem>>, vector<16x256xbf16>
    tpu.vector_store %arg11[%c16, %c0_18], %25 {strides = array<i32>} : memref<144x256xbf16, #tpu.memory_space<vmem>>, vector<16x256xbf16>,
    %c0_19 = arith.constant 0 : index
    %c113 = arith.constant 113 : index
    %27 = vector.load %arg10[%c0_19, %c113] : memref<16x512xf32, #tpu.memory_space<vmem>>, vector<16x256xf32>
    %28 = vector.extract_strided_slice %14 {offsets = [2, 0], sizes = [1, 256], strides = [1, 1]} : vector<9x256xf32> to vector<1x256xf32>
    %29 = vector.broadcast %28 : vector<1x256xf32> to vector<16x256xf32>
    %30 = arith.mulf %27, %29 : vector<16x256xf32>
    %31 = arith.truncf %30 : vector<16x256xf32> to vector<16x256xbf16>
    %c32 = arith.constant 32 : index
    %c0_20 = arith.constant 0 : index
    %32 = vector.load %arg11[%c32, %c0_20] : memref<144x256xbf16, #tpu.memory_space<vmem>>, vector<16x256xbf16>
    tpu.vector_store %arg11[%c32, %c0_20], %31 {strides = array<i32>} : memref<144x256xbf16, #tpu.memory_space<vmem>>, vector<16x256xbf16>,
    %c0_21 = arith.constant 0 : index
    %c127 = arith.constant 127 : index
    %33 = vector.load %arg10[%c0_21, %c127] : memref<16x512xf32, #tpu.memory_space<vmem>>, vector<16x256xf32>
    %34 = vector.extract_strided_slice %14 {offsets = [3, 0], sizes = [1, 256], strides = [1, 1]} : vector<9x256xf32> to vector<1x256xf32>
    %35 = vector.broadcast %34 : vector<1x256xf32> to vector<16x256xf32>
    %36 = arith.mulf %33, %35 : vector<16x256xf32>
    %37 = arith.truncf %36 : vector<16x256xf32> to vector<16x256xbf16>
    %c48 = arith.constant 48 : index
    %c0_22 = arith.constant 0 : index
    %38 = vector.load %arg11[%c48, %c0_22] : memref<144x256xbf16, #tpu.memory_space<vmem>>, vector<16x256xbf16>
    tpu.vector_store %arg11[%c48, %c0_22], %37 {strides = array<i32>} : memref<144x256xbf16, #tpu.memory_space<vmem>>, vector<16x256xbf16>,
    %c0_23 = arith.constant 0 : index
    %c128_24 = arith.constant 128 : index
    %39 = vector.load %arg10[%c0_23, %c128_24] : memref<16x512xf32, #tpu.memory_space<vmem>>, vector<16x256xf32>
    %40 = vector.extract_strided_slice %14 {offsets = [4, 0], sizes = [1, 256], strides = [1, 1]} : vector<9x256xf32> to vector<1x256xf32>
    %41 = vector.broadcast %40 : vector<1x256xf32> to vector<16x256xf32>
    %42 = arith.mulf %39, %41 : vector<16x256xf32>
    %43 = arith.truncf %42 : vector<16x256xf32> to vector<16x256xbf16>
    %c64 = arith.constant 64 : index
    %c0_25 = arith.constant 0 : index
    %44 = vector.load %arg11[%c64, %c0_25] : memref<144x256xbf16, #tpu.memory_space<vmem>>, vector<16x256xbf16>
    tpu.vector_store %arg11[%c64, %c0_25], %43 {strides = array<i32>} : memref<144x256xbf16, #tpu.memory_space<vmem>>, vector<16x256xbf16>,
    %c0_26 = arith.constant 0 : index
    %c129 = arith.constant 129 : index
    %45 = vector.load %arg10[%c0_26, %c129] : memref<16x512xf32, #tpu.memory_space<vmem>>, vector<16x256xf32>
    %46 = vector.extract_strided_slice %14 {offsets = [5, 0], sizes = [1, 256], strides = [1, 1]} : vector<9x256xf32> to vector<1x256xf32>
    %47 = vector.broadcast %46 : vector<1x256xf32> to vector<16x256xf32>
    %48 = arith.mulf %45, %47 : vector<16x256xf32>
    %49 = arith.truncf %48 : vector<16x256xf32> to vector<16x256xbf16>
    %c80 = arith.constant 80 : index
    %c0_27 = arith.constant 0 : index
    %50 = vector.load %arg11[%c80, %c0_27] : memref<144x256xbf16, #tpu.memory_space<vmem>>, vector<16x256xbf16>
    tpu.vector_store %arg11[%c80, %c0_27], %49 {strides = array<i32>} : memref<144x256xbf16, #tpu.memory_space<vmem>>, vector<16x256xbf16>,
    %c0_28 = arith.constant 0 : index
    %c143 = arith.constant 143 : index
    %51 = vector.load %arg10[%c0_28, %c143] : memref<16x512xf32, #tpu.memory_space<vmem>>, vector<16x256xf32>
    %52 = vector.extract_strided_slice %14 {offsets = [6, 0], sizes = [1, 256], strides = [1, 1]} : vector<9x256xf32> to vector<1x256xf32>
    %53 = vector.broadcast %52 : vector<1x256xf32> to vector<16x256xf32>
    %54 = arith.mulf %51, %53 : vector<16x256xf32>
    %55 = arith.truncf %54 : vector<16x256xf32> to vector<16x256xbf16>
    %c96 = arith.constant 96 : index
    %c0_29 = arith.constant 0 : index
    %56 = vector.load %arg11[%c96, %c0_29] : memref<144x256xbf16, #tpu.memory_space<vmem>>, vector<16x256xbf16>
    tpu.vector_store %arg11[%c96, %c0_29], %55 {strides = array<i32>} : memref<144x256xbf16, #tpu.memory_space<vmem>>, vector<16x256xbf16>,
    %c0_30 = arith.constant 0 : index
    %c144 = arith.constant 144 : index
    %57 = vector.load %arg10[%c0_30, %c144] : memref<16x512xf32, #tpu.memory_space<vmem>>, vector<16x256xf32>
    %58 = vector.extract_strided_slice %14 {offsets = [7, 0], sizes = [1, 256], strides = [1, 1]} : vector<9x256xf32> to vector<1x256xf32>
    %59 = vector.broadcast %58 : vector<1x256xf32> to vector<16x256xf32>
    %60 = arith.mulf %57, %59 : vector<16x256xf32>
    %61 = arith.truncf %60 : vector<16x256xf32> to vector<16x256xbf16>
    %c112_31 = arith.constant 112 : index
    %c0_32 = arith.constant 0 : index
    %62 = vector.load %arg11[%c112_31, %c0_32] : memref<144x256xbf16, #tpu.memory_space<vmem>>, vector<16x256xbf16>
    tpu.vector_store %arg11[%c112_31, %c0_32], %61 {strides = array<i32>} : memref<144x256xbf16, #tpu.memory_space<vmem>>, vector<16x256xbf16>,
    %c0_33 = arith.constant 0 : index
    %c145 = arith.constant 145 : index
    %63 = vector.load %arg10[%c0_33, %c145] : memref<16x512xf32, #tpu.memory_space<vmem>>, vector<16x256xf32>
    %64 = vector.extract_strided_slice %14 {offsets = [8, 0], sizes = [1, 256], strides = [1, 1]} : vector<9x256xf32> to vector<1x256xf32>
    %65 = vector.broadcast %64 : vector<1x256xf32> to vector<16x256xf32>
    %66 = arith.mulf %63, %65 : vector<16x256xf32>
    %67 = arith.truncf %66 : vector<16x256xf32> to vector<16x256xbf16>
    %c128_34 = arith.constant 128 : index
    %c0_35 = arith.constant 0 : index
    %68 = vector.load %arg11[%c128_34, %c0_35] : memref<144x256xbf16, #tpu.memory_space<vmem>>, vector<16x256xbf16>
    tpu.vector_store %arg11[%c128_34, %c0_35], %67 {strides = array<i32>} : memref<144x256xbf16, #tpu.memory_space<vmem>>, vector<16x256xbf16>,
    %c0_36 = arith.constant 0 : index
    %c0_37 = arith.constant 0 : index
    %69 = vector.load %arg5[%c0_36, %c0_37] : memref<16x144xbf16, #tpu.memory_space<vmem>>, vector<16x144xbf16>
    %c0_38 = arith.constant 0 : index
    %c0_39 = arith.constant 0 : index
    %70 = vector.load %arg11[%c0_38, %c0_39] : memref<144x256xbf16, #tpu.memory_space<vmem>>, vector<144x256xbf16>
    %cst_40 = arith.constant dense<0.000000e+00> : vector<16x256xf32>
    %71 = tpu.matmul %69, %70, %cst_40 {dimension_numbers = #tpu.dot_dimension_numbers<[1], [0], [0], [1], [0, 0, 1, 1], [], []>} : vector<16x144xbf16>, vector<144x256xbf16>, vector<16x256xf32> -> vector<16x256xf32>
    %c0_41 = arith.constant 0 : index
    %c0_42 = arith.constant 0 : index
    %72 = vector.load %arg6[%c0_41, %c0_42] : memref<16x1xf32, #tpu.memory_space<vmem>>, vector<16x1xf32>
    %73 = vector.broadcast %72 : vector<16x1xf32> to vector<16x256xf32>
    %74 = arith.addf %71, %73 : vector<16x256xf32>
    %c0_43 = arith.constant 0 : index
    %c0_44 = arith.constant 0 : index
    %75 = vector.load %arg7[%c0_43, %c0_44] : memref<32x16xbf16, #tpu.memory_space<vmem>>, vector<32x16xbf16>
    %76 = arith.truncf %74 : vector<16x256xf32> to vector<16x256xbf16>
    %cst_45 = arith.constant dense<0.000000e+00> : vector<32x256xf32>
    %77 = tpu.matmul %75, %76, %cst_45 {dimension_numbers = #tpu.dot_dimension_numbers<[1], [0], [0], [1], [0, 0, 1, 1], [], []>} : vector<32x16xbf16>, vector<16x256xbf16>, vector<32x256xf32> -> vector<32x256xf32>
    %c0_46 = arith.constant 0 : index
    %c0_47 = arith.constant 0 : index
    %78 = vector.load %arg8[%c0_46, %c0_47] : memref<32x1xf32, #tpu.memory_space<vmem>>, vector<32x1xf32>
    %79 = vector.broadcast %78 : vector<32x1xf32> to vector<32x256xf32>
    %80 = arith.addf %77, %79 : vector<32x256xf32>
    %c0_48 = arith.constant 0 : index
    %c0_49 = arith.constant 0 : index
    %c0_50 = arith.constant 0 : index
    %81 = vector.load %arg1[%c0_48, %c0_49, %c0_50] : memref<1x32x256xf32, #tpu.memory_space<vmem>>, vector<1x32x256xf32>
    %82 = vector.shape_cast %81 : vector<1x32x256xf32> to vector<32x256xf32>
    %83 = arith.addf %82, %80 : vector<32x256xf32>
    %c0_51 = arith.constant 0 : index
    %c0_52 = arith.constant 0 : index
    %c0_53 = arith.constant 0 : index
    %84 = vector.load %arg9[%c0_51, %c0_52, %c0_53] : memref<1x32x256xf32, #tpu.memory_space<vmem>>, vector<1x32x256xf32>
    %85 = vector.shape_cast %84 : vector<1x32x256xf32> to vector<32x256xf32>
    %86 = vector.shape_cast %83 : vector<32x256xf32> to vector<1x32x256xf32>
    tpu.vector_store %arg9[%c0_51, %c0_52, %c0_53], %86 {strides = array<i32>} : memref<1x32x256xf32, #tpu.memory_space<vmem>>, vector<1x32x256xf32>,
    return
  }
  func.func @transform_0(%arg0: i32) -> (i32, i32, i32) {
    %c0_i32 = arith.constant 0 : i32
    %c0_i32_0 = arith.constant 0 : i32
    %c0_i32_1 = arith.constant 0 : i32
    return %arg0, %c0_i32, %c0_i32_0 : i32, i32, i32
  }
  func.func @transform_1(%arg0: i32) -> (i32, i32) {
    %c0_i32 = arith.constant 0 : i32
    %c0_i32_0 = arith.constant 0 : i32
    %c0_i32_1 = arith.constant 0 : i32
    return %c0_i32, %c0_i32_0 : i32, i32
  }
  func.func @transform_2(%arg0: i32) -> (i32, i32) {
    %c0_i32 = arith.constant 0 : i32
    %c0_i32_0 = arith.constant 0 : i32
    %c0_i32_1 = arith.constant 0 : i32
    return %c0_i32, %c0_i32_0 : i32, i32
  }
  func.func @transform_3(%arg0: i32) -> (i32, i32) {
    %c0_i32 = arith.constant 0 : i32
    %c0_i32_0 = arith.constant 0 : i32
    %c0_i32_1 = arith.constant 0 : i32
    return %c0_i32, %c0_i32_0 : i32, i32
  }
  func.func @transform_4(%arg0: i32) -> (i32, i32) {
    %c0_i32 = arith.constant 0 : i32
    %c0_i32_0 = arith.constant 0 : i32
    %c0_i32_1 = arith.constant 0 : i32
    return %c0_i32, %c0_i32_0 : i32, i32
  }
  func.func @transform_5(%arg0: i32) -> (i32, i32) {
    %c0_i32 = arith.constant 0 : i32
    %c0_i32_0 = arith.constant 0 : i32
    %c0_i32_1 = arith.constant 0 : i32
    return %c0_i32, %c0_i32_0 : i32, i32
  }
  func.func @transform_6(%arg0: i32) -> (i32, i32) {
    %c0_i32 = arith.constant 0 : i32
    %c0_i32_0 = arith.constant 0 : i32
    %c0_i32_1 = arith.constant 0 : i32
    return %c0_i32, %c0_i32_0 : i32, i32
  }
  func.func @transform_7(%arg0: i32) -> (i32, i32) {
    %c0_i32 = arith.constant 0 : i32
    %c0_i32_0 = arith.constant 0 : i32
    %c0_i32_1 = arith.constant 0 : i32
    return %c0_i32, %c0_i32_0 : i32, i32
  }
  func.func @transform_8(%arg0: i32) -> (i32, i32, i32) {
    %c0_i32 = arith.constant 0 : i32
    %c0_i32_0 = arith.constant 0 : i32
    %c0_i32_1 = arith.constant 0 : i32
    return %arg0, %c0_i32, %c0_i32_0 : i32, i32, i32
  }
}

</mosaic_0001>

<bundles_post_ra>
// kernel: tpu_custom_call.1
= control target key start
LH: loop header
LB: loop body
LE: loop exit
PB: predicated region body
PF: predicated region fallthrough
CT: control target
= control target key end

     0   :  { %13 = vsyncpa [#allocation5], 0  ;;  %s1837_s0 = inlined_call_operand.hbm [shape: f32[2,32,256], index: 0, kind: input, shape index: {}]   ;;  %s1838_s1 = inlined_call_operand.vmem [shape: f32[9,256], index: 1, kind: input, shape index: {}]   ;;  %s1839_s2 = inlined_call_operand.vmem [shape: bf16[16,32], index: 2, kind: input, shape index: {}]   ;;  %s1840_s3 = inlined_call_operand.vmem [shape: f32[16,1], index: 3, kind: input, shape index: {}]   ;;  %s1841_s4 = inlined_call_operand.vmem [shape: bf16[16,144], index: 4, kind: input, shape index: {}]   ;;  %s1842_s5 = inlined_call_operand.vmem [shape: f32[16,1], index: 5, kind: input, shape index: {}]   ;;  %s1843_s6 = inlined_call_operand.vmem [shape: bf16[32,16], index: 6, kind: input, shape index: {}]   ;;  %s1844_s7 = inlined_call_operand.vmem [shape: f32[32,1], index: 7, kind: input, shape index: {}]   ;;  %s1845_s8 = inlined_call_operand.hbm [shape: f32[2,32,256], index: 8, kind: output, shape index: {}]  }
   0x1   :  { %15 = vsyncpa [#allocation5 + $0x1], 0 }
   0x2   :  { %16 = vsyncpa [#allocation6], 0 }
   0x3   :  { %18 = vsyncpa [#allocation6 + $0x1], 0  ;;  %s1386_s27 = smov 0   ;;  %s1388_s28 = smov 0  }
   0x4   :  { %s1390_s29 = smov 0   ;;  %s1392_s30 = smov 0  }
   0x5 LB: > { %s1407_s9 = sadd.s32 4294967295, %s1325_s30   ;;  %s1136_s10 = sadd.s32 4294967294, %s1325_s30   ;;  %s1325_s30 = sphi %s1392_s30, %s1860_s30   ;;  %s1321_s29 = sphi %s1390_s29, %s1859_s29   ;;  %s1317_s28 = sphi %s1388_s28, %s1858_s28   ;;  %s1313_s27 = sphi %s1386_s27, %s1857_s27  }
   0x6   : > { %s1411_s11 = sadd.s32 1, %s1325_s30   ;;  %s31_s12 = sadd.s32 1, %s1321_s29 }
   0x7   : > { %s28_s13 = ssub.s32 %s1325_s30, %s1411_s11  ;;  %p38_p0 = scmp.ne.s32.totalorder %s1321_s29, %s1317_s28 }
   0x8   : > { %p29_p1 = scmp.eq.s32.totalorder %s28_s13, 0  ;;  %p39_p2 = scmp.eq.s32.totalorder %s1325_s30, 0 }
   0x9   : > { %p44_p3 = scmp.ne.s32.totalorder %s1317_s28, %s1313_s27  ;;  %p45_p4 = scmp.eq.s32.totalorder %s1407_s9, 0 }
   0xa   : > { %s1423_s14 = scalar_select %p29_p1, %s1321_s29, %s31_s12  }
   0xb   : > { %p1425_p5 = por %p39_p2, %p38_p0  ;;  %p1429_p6 = por %p45_p4, %p44_p3 }
   0xc   : > { %p215_p7 = scmp.eq.s32.totalorder %s1407_s9, 1  ;;  %p221_p8 = scmp.eq.s32.totalorder %s1136_s10, 1 }
   0xd   : > { %p1175_p10 = scmp.lt.s32.totalorder %s1325_s30, 2  ;;  %s262_s19 = sand.u32 1, %s1321_s29  }
   0xe   : > { %p1436_p11 = por %p215_p7, %p38_p0  ;;  %p1440_p12 = por %p221_p8, %p44_p3 }
   0xf   : > { %s1161_s20 = sshll.u32 %s1325_s30, 10  ;;  %s1139_s21 = sshll.u32 %s262_s19, 6 }
  0x10   : > { %s1850_s17 = scalar_select %p1436_p11, 1, 0 }
  0x11   : > { %s1851_s18 = scalar_select %p1440_p12, 1, 0 }
  0x12   : > { %s1449_s24 = scalar_lea.hbm %s1837_s0, %s1161_s20  ;;  %s266_s25 = scalar_lea.vmem [#allocation4], %s1139_s21 }
  0x13   : > { %s273_s26 = sshll.u32 %s266_s25, 4  ;;  %p1453_p13 = pnand %p1175_p10, %p1425_p5  ;;  %s1457_s26 = int_to_ptr.vmem [resolvable:$true] %s273_s26 }
  0x14   : > { %s1459_s12 = scalar_lea.sflag [#allocation5], %s262_s19  ;;  %s1229_s13 = scalar_lea.hbm %s1449_s24, 1024 }
  0x15   : > { %p1230_p0 = scmp.ne.s32.totalorder %s1449_s24, %s1229_s13  ;;  %p1231_p1 = pneg %p1453_p13 }
  0x16   : > { %s1234_s21 = scalar_lea.hbm %s1837_s0, 2048  ;;  %p1235_p4 = scmp.lt.u32.totalorder %s1449_s24, %s1837_s0 }
  0x17   : > { %p1232_p2 = pnand %p1231_p1, %p1230_p0  ;;  %p1236_p5 = scmp.lt.u32.totalorder %s1234_s21, %s1229_s13 }
  0x18   : > { %p1238_p8 = scmp.lt.u32.totalorder %s1229_s13, %s1449_s24 }
  0x19   : > { %p1233_p3 = pneg %p1232_p2  ;;  %p1237_p7 = por %p1236_p5, %p1235_p4 }
  0x1b   : > { %p1239_p10 = por %p1238_p8, %p1237_p7 }
  0x1d   : > { %p1240_p9 = pnand %p1239_p10, %p1233_p3 }
  0x1f   : > { %1243 = shalt.err (!%p1240_p9)
}
  0x20   : > { %s1244_s19 = scalar_lea.vmem %s1457_s26, 1024  ;;  %s1327_s25 = smov [#allocation4]  }
  0x21   : > { %p1245_p0 = scmp.ne.s32.totalorder %s1457_s26, %s1244_s19  ;;  %s1249_s20 = sshll.u32 %s1327_s25, 4  ;;  %s1250_s20 = int_to_ptr.vmem [resolvable:$false] %s1249_s20 }
  0x22   : > { %s1251_s15 = scalar_lea.vmem %s1250_s20, 2048  ;;  %p1252_p11 = scmp.lt.s32.totalorder %s1457_s26, %s1250_s20 }
  0x23   : > { %p1247_p2 = pnand %p1245_p0, %p1231_p1  ;;  %p1253_p4 = scmp.lt.s32.totalorder %s1251_s15, %s1244_s19 }
  0x25   : > { %p1248_p12 = pneg %p1247_p2  ;;  %p1254_p5 = por %p1253_p4, %p1252_p11 }
  0x27   : > { %p1255_p7 = pnand %p1254_p5, %p1248_p12 }
  0x29   : > { %1258 = shalt.err (!%p1255_p7)
}
  0x2a   : > { %s1328_s13 = smov 256   ;;  %s1329_s21 = smov 16  }
  0x2b   : > { %1170 = dma.hbm_to_vmem [thread:$0]  (!%p1453_p13), %s1449_s24, 1024, %s1457_s26, %s1459_s12, %s1328_s13, %s1328_s13, %s1329_s21  }
  0x2c   : > { %p1142_p9 = scmp.ge.s32.totalorder %s1325_s30, 1  ;;  %p281_p1 = scmp.lt.s32.totalorder %s1325_s30, 3 }
  0x2e   : > { %p282_p3 = pnand %p1142_p9, %p281_p1 }
  0x2f   : > { %s1490_s22 = sand.u32 (!%p282_p3), 1, %s1317_s28  }
  0x30   : > { %285 = sbr.rel (%p282_p3) target bundleno = 913 (0x391), region = 52  ;;  %s1847_s23 = sshll.u32 (!%p282_p3), %s1490_s22, 6 }
  0x31   : > { %s288_s19 = scalar_lea.sflag (!%p282_p3), [#allocation5], %s1490_s22  ;;  %s291_s25 = scalar_lea.vmem (!%p282_p3), [#allocation4], %s1847_s23 }
  0x37   : > { %1304 = dma.done.wait (%p1429_p6), %s288_s19, 1024  }
  0x38   : > { %1306 = vsyncadd (%p1429_p6), %s288_s19, 4294966272  ;;  %v425_v0 = vlaneseq  ;;  %v1330_v1 = vmov 0   ;;  %v1505_v3 = vld [vmem:[%s291_s25 + $0x8] sm:$0xff]  ;;  %v1507_v4 = vld [vmem:[%s291_s25 + $0x18] sm:$0xff]  ;;  %vm360_vm0 = vcmask 261120   ;;  %s1332_s16 = smov 112  }
  0x39   : > { %396 = vmatprep.mubr.bf16.mxu0 %v1330_v1  ;;  %1221 = vset.pattern.permute.xlu0 %v1330_v1  ;;  %v1509_v5 = vld [vmem:[%s291_s25] sm:$0xff]  ;;  %v340_v6 = vpack.c.bf16 %v1507_v4, %v1505_v3  ;;  %v1513_v7 = vld [vmem:[%s291_s25 + $0x10] sm:$0xff]  ;;  %v1515_v8 = vld [vmem:[%s291_s25 + $0x28] sm:$0xff]  ;;  %s1333_s24 = smov 113   ;;  %s1334_s26 = smov 127   ;;  %vm439_vm1 = vcmask 908288  }
  0x3a   : > { %1222 = vset.pattern.permute.xlu1 %v1330_v1  ;;  %v1503_v2 = vshrl.u32 %v425_v0, 7  ;;  %v1517_v9 = vld [vmem:[%s291_s25 + $0x38] sm:$0xff]  ;;  %v339_v11 = vpack.c.bf16 %v1513_v7, %v1509_v5  ;;  %v1524_v13 = vld [vmem:[%s291_s25 + $0x20] sm:$0xff]  ;;  %v1526_v14 = vld [vmem:[%s291_s25 + $0x30] sm:$0xff]  ;;  %s1331_s25 = smov 111   ;;  %s1335_s10 = smov 1  }
  0x3b   : > { %v342_v12 = vpack.c.bf16 %v1517_v9, %v1515_v8  ;;  %364 = vmatprep.subr.bf16.mxu0 %v340_v6  ;;  %v343_v15 = vld [vmem:[%s1840_s3] sm:$0xff]  ;;  %v341_v16 = vpack.c.bf16 %v1526_v14, %v1524_v13  ;;  %v1541_v18 = vld [vmem:[%s1838_s1 + $0x8] sm:$0xff]  ;;  %s1336_s12 = smov 15   ;;  %s1337_s20 = smov 16   ;;  %v1147_v41 = vld [vmem:[%s1838_s1 + $0x10] ss:$0 sm:$0xff] }
  0x3c   : > { %v427_v10 = vsub.s32 0, %v1503_v2  ;;  %365 = vmatpush1.bf16.msra.mxu0 %v339_v11  ;;  %347 = vperm.xlu0 %1221, %v343_v15   ;;  %v1536_v17 = vld [vmem:[%s1838_s1] sm:$0xff]  ;;  %v477_v19 = vsub.s32 1, %v1503_v2  ;;  %v344_v20 = vld [vmem:[%s1840_s3 + $0x8] sm:$0xff]  ;;  %v527_v25 = vsub.s32 2, %v1503_v2  ;;  %v577_v28 = vsub.s32 3, %v1503_v2 }
  0x3d   : > { %366 = vmatprep.subr.bf16.mxu0 %v342_v12  ;;  %v1223_v22 = vld [vmem:[%s1839_s2] sm:$0xff]   ;;  %v647_v31 = vsub.s32 5, %v1503_v2  ;;  %v697_v34 = vsub.s32 6, %v1503_v2  ;;  %v747_v37 = vsub.s32 7, %v1503_v2  ;;  %v1148_v42 = vld [vmem:[%s1838_s1 + $0x18] ss:$0 sm:$0xff] }
  0x3e   : > { %v428_v21 = vrot.slane %v1536_v17, %v427_v10  ;;  %v432_v23 = vrot.slane %v1541_v18, %v427_v10  ;;  %v478_v24 = vrot.slane %v1536_v17, %v477_v19  ;;  %v482_v26 = vrot.slane %v1541_v18, %v477_v19  ;;  %s1338_s23 = smov 17   ;;  %s1853_s19 = sshll.u32 %s1490_s22, 6 }
  0x3f   : > { %v528_v27 = vrot.slane %v1536_v17, %v527_v25  ;;  %v532_v29 = vrot.slane %v1541_v18, %v527_v25  ;;  %v578_v30 = vrot.slane %v1536_v17, %v577_v28  ;;  %v582_v32 = vrot.slane %v1541_v18, %v577_v28  ;;  %p1854_p11 = scmp.ne.s32.totalorder %s1850_s17, 0  ;;  %s1339_s13 = smov [#allocation7]  }
  0x40   : > { %435 = vrot.lane.b32.xlu1 %v428_v21, %s1331_s25  ;;  %367 = vmatpush1.bf16.msra.mxu0 %v341_v16  ;;  %v648_v33 = vrot.slane %v1536_v17, %v647_v31  ;;  %v652_v35 = vrot.slane %v1541_v18, %v647_v31  ;;  %v698_v36 = vrot.slane %v1536_v17, %v697_v34  ;;  %v625_v6 = vsub.s32 4, %v1503_v2  ;;  %s1263_s21 = sshll.u32 %s1339_s13, 4  ;;  %s1264_s21 = int_to_ptr.vmem [resolvable:$false] %s1263_s21 }
  0x41   : > { %352 = vperm.xlu0 %1221, %v344_v20   ;;  %v702_v38 = vrot.slane %v1541_v18, %v697_v34  ;;  %v748_v39 = vrot.slane %v1536_v17, %v747_v37  ;;  %v752_v40 = vrot.slane %v1541_v18, %v747_v37  ;;  %vm489_vm2 = vcmask 916480  }
  0x42   : > { %vm539_vm3 = vcmask 924672   ;;  %vm589_vm4 = vcmask 1039360   ;;  %vm612_vm5 = vcmask 7168   ;;  %vm562_vm6 = vcmask 121856  }
  0x43   : > { %1146 = vmatmul.mubr.msk.bf16.vlgmr.msra.gmra.mrb[0].mxu0 %vm360_vm0, %v1223_v22  ;;  %vm512_vm7 = vcmask 130048   ;;  %vm462_vm8 = vcmask 138240   ;;  %v1620_v20 = vrot.slane %v1541_v18, %v625_v6  ;;  %v1623_v2 = vrot.slane %v1536_v17, %v625_v6 }
  0x44   : > { %437 = vrot.lane.b32.xlu1 %v432_v23, %s1331_s25  ;;  %1004 = vmatprep.mubr.bf16.mxu0 %v1330_v1 }
  0x45   : > { %485 = vrot.lane.b32.xlu0 %v478_v24, %s1332_s16 }
  0x48   : > { %487 = vrot.lane.b32.xlu1 %v482_v26, %s1332_s16 }
  0x49   : > { %535 = vrot.lane.b32.xlu0 %v528_v27, %s1333_s24 }
  0x4c   : > { %537 = vrot.lane.b32.xlu1 %v532_v29, %s1333_s24 }
  0x4d   : > { %585 = vrot.lane.b32.xlu0 %v578_v30, %s1334_s26 }
  0x50   : > { %587 = vrot.lane.b32.xlu1 %v582_v32, %s1334_s26 }
  0x51   : > { %655 = vrot.lane.b32.xlu0 %v648_v33, %s1335_s10 }
  0x54   : > { %657 = vrot.lane.b32.xlu1 %v652_v35, %s1335_s10 }
  0x55   : > { %705 = vrot.lane.b32.xlu0 %v698_v36, %s1336_s12 }
  0x58   : > { %707 = vrot.lane.b32.xlu1 %v702_v38, %s1336_s12 }
  0x59   : > { %755 = vrot.lane.b32.xlu0 %v748_v39, %s1337_s20 }
  0x5c   : > { %757 = vrot.lane.b32.xlu1 %v752_v40, %s1337_s20 }
  0x5d   : > { %805 = vrot.lane.b32.xlu0 %v1147_v41, %s1338_s23 }
  0x60   : > { %807 = vrot.lane.b32.xlu1 %v1148_v42, %s1338_s23 }
  0xb2   : > { %v436_v43 = vpop.permute.xlu1 %435 }
  0xb3   : > { %v444_v44 = vmul.f32 0.0, %v436_v43 }
  0xb5   : > { %v450_v45 = vpack.c.bf16 %v444_v44, %v444_v44 }
  0xb6   : > { %v438_v54 = vpop.permute.xlu1 %437 }
  0xb7   : > { %456 = vrot.lane.b32.xlu0 %v450_v45, %s1338_s23  ;;  %v440_v15 = vsel %vm439_vm1, %v436_v43, %v438_v54 }
  0xba   : > { %v1595_v55 = vpop.permute.xlu1 %487 }
  0xbb   : > { %v348_v46 = vpop.permute.xlu0 %347 }
  0xbe   : > { %v1597_v56 = vpop.permute.xlu1 %537 }
  0xc0   : > { %v353_v47 = vpop.permute.xlu0 %352 }
  0xc2   : > { %v1599_v57 = vpop.permute.xlu1 %587 }
  0xc4   : > { %v486_v48 = vpop.permute.xlu0 %485 }
  0xc5   : > { %v494_v49 = vmul.f32 0.0, %v486_v48  ;;  %v490_v21 = vsel %vm489_vm2, %v486_v48, %v1595_v55 }
  0xc6   : > { %v1603_v59 = vpop.permute.xlu1 %657 }
  0xc7   : > { %v500_v50 = vpack.c.bf16 %v494_v49, %v494_v49 }
  0xc8   : > { %v536_v51 = vpop.permute.xlu0 %535 }
  0xc9   : > { %v544_v52 = vmul.f32 0.0, %v536_v51  ;;  %506 = vrot.lane.b32.xlu1 %v500_v50, %s1337_s20  ;;  %v540_v22 = vsel %vm539_vm3, %v536_v51, %v1597_v56 }
  0xca   : > { %v1607_v61 = vpop.permute.xlu1 %707 }
  0xcb   : > { %v550_v53 = vpack.c.bf16 %v544_v52, %v544_v52 }
  0xcc   : > { %v1601_v58 = vpop.permute.xlu0 %585 }
  0xcd   : > { %556 = vrot.lane.b32.xlu0 %v550_v53, %s1336_s12  ;;  %v590_v23 = vsel %vm589_vm4, %v1601_v58, %v1599_v57 }
  0xce   : > { %v1611_v63 = vpop.permute.xlu1 %757 }
  0xd0   : > { %v1605_v60 = vpop.permute.xlu0 %655 }
  0xd1   : > { %v660_v18 = vsel %vm612_vm5, %v1605_v60, %v1603_v59 }
  0xd2   : > { %v1616_v10 = vpop.permute.xlu1 %807 }
  0xd4   : > { %v1609_v62 = vpop.permute.xlu0 %705 }
  0xd5   : > { %v710_v29 = vsel %vm562_vm6, %v1609_v62, %v1607_v61 }
  0xd8   : > { %v1613_v0 = vpop.permute.xlu0 %755 }
  0xd9   : > { %v760_v30 = vsel %vm512_vm7, %v1613_v0, %v1611_v63 }
  0xdc   : > { %v806_v12 = vpop.permute.xlu0 %805 }
  0xdd   : > { %v810_v28 = vsel %vm462_vm8, %v806_v12, %v1616_v10 }
 0x116   : > { %v398_v11 = vpop.f32.mrb[0].mxu0 }
 0x117   : > { %v399_v16 = vadd.f32 %v398_v11, %v348_v46  ;;  %v400_v19 = vpop.f32.mrb[1].mxu0 }
 0x118   : > { %v401_v24 = vadd.f32 %v400_v19, %v348_v46  ;;  %v402_v25 = vpop.f32.mrb[2].mxu0 }
 0x119   : > { %v1635_v26 = vmax.f32 %v399_v16, 0.0  ;;  %v403_v17 = vadd.f32 %v402_v25, %v353_v47  ;;  %v404_v27 = vpop.f32.mrb[3].mxu0 }
 0x11a   : > { %v408_v31 = vmax.f32 %v401_v24, 0.0  ;;  %v405_v32 = vadd.f32 %v404_v27, %v353_v47 }
 0x11b   : > { %v409_v33 = vmax.f32 %v403_v17, 0.0  ;;  %v1646_v34 = vmul.f32 %v806_v12, %v1635_v26  ;;  %v495_v35 = vmul.f32 %v490_v21, %v1635_v26  ;;  %v445_v36 = vmul.f32 %v440_v15, %v1635_v26 }
 0x11c   : > { %v410_v37 = vmax.f32 %v405_v32, 0.0  ;;  %v1650_v38 = vmul.f32 %v810_v28, %v408_v31  ;;  %v446_v39 = vmul.f32 %v438_v54, %v408_v31  ;;  %v545_v40 = vmul.f32 %v540_v22, %v1635_v26 }
 0x11d   : > { %v1653_v41 = vmul.f32 %v806_v12, %v409_v33  ;;  %v498_v42 = vmul.f32 %v490_v21, %v409_v33  ;;  %v448_v43 = vmul.f32 %v440_v15, %v409_v33  ;;  %v548_v44 = vmul.f32 %v540_v22, %v409_v33 }
 0x11e   : > { %v1655_v45 = vmul.f32 %v810_v28, %v410_v37  ;;  %v449_v46 = vmul.f32 %v438_v54, %v410_v37  ;;  %v595_v47 = vmul.f32 %v590_v23, %v1635_v26  ;;  %v598_v48 = vmul.f32 %v590_v23, %v409_v33 }
 0x11f   : > { %v501_v49 = vpack.c.bf16 %v498_v42, %v495_v35  ;;  %v451_v50 = vpack.c.bf16 %v448_v43, %v445_v36  ;;  %v551_v51 = vpack.c.bf16 %v548_v44, %v545_v40  ;;  %v496_v52 = vmul.f32 %v1595_v55, %v408_v31 }
 0x120   : > { %v452_v53 = vpack.c.bf16 %v449_v46, %v446_v39  ;;  %v601_v6 = vpack.c.bf16 %v598_v48, %v595_v47  ;;  %v499_v11 = vmul.f32 %v1595_v55, %v410_v37  ;;  %v546_v12 = vmul.f32 %v1597_v56, %v408_v31  ;;  %v934_v47 = vld [vmem:[%s1844_s7 + $0x10] sm:$0xff]  ;;  %v860_v48 = vld [vmem:[%s1842_s5 + $0x8] sm:$0xff] }
 0x121   : > { %508 = vrot.lane.b32.xlu1 %v501_v49, %s1337_s20  ;;  %458 = vrot.lane.b32.xlu0 %v451_v50, %s1338_s23  ;;  %v549_v54 = vmul.f32 %v1597_v56, %v410_v37  ;;  %v664_v15 = vmul.f32 %v1605_v60, %v1635_v26  ;;  %v667_v16 = vmul.f32 %v1605_v60, %v409_v33  ;;  %v933_v49 = vld [vmem:[%s1844_s7 + $0x8] sm:$0xff]  ;;  %v935_v50 = vld [vmem:[%s1844_s7 + $0x18] sm:$0xff] }
 0x122   : > { %v502_v19 = vpack.c.bf16 %v499_v11, %v496_v52  ;;  %v596_v21 = vmul.f32 %v1599_v57, %v408_v31  ;;  %v599_v22 = vmul.f32 %v1599_v57, %v410_v37  ;;  %v714_v55 = vmul.f32 %v1609_v62, %v1635_v26 }
 0x123   : > { %v552_v23 = vpack.c.bf16 %v549_v54, %v546_v12  ;;  %v670_v24 = vpack.c.bf16 %v667_v16, %v664_v15  ;;  %v717_v25 = vmul.f32 %v1609_v62, %v409_v33  ;;  %v665_v17 = vmul.f32 %v660_v18, %v408_v31 }
 0x124   : > { %v602_v27 = vpack.c.bf16 %v599_v22, %v596_v21  ;;  %v668_v56 = vmul.f32 %v660_v18, %v410_v37  ;;  %v715_v28 = vmul.f32 %v710_v29, %v408_v31  ;;  %v718_v32 = vmul.f32 %v710_v29, %v410_v37 }
 0x125   : > { %460 = vrot.lane.b32.xlu1 %v452_v53, %s1338_s23  ;;  %558 = vrot.lane.b32.xlu0 %v551_v51, %s1336_s12  ;;  %v720_v60 = vpack.c.bf16 %v717_v25, %v714_v55  ;;  %v764_v57 = vmul.f32 %v1613_v0, %v1635_v26  ;;  %v767_v35 = vmul.f32 %v1613_v0, %v409_v33  ;;  %s323_s23 = scalar_lea.vmem [#allocation7], %s1853_s19 }
 0x126   : > { %v671_v36 = vpack.c.bf16 %v668_v56, %v665_v17  ;;  %v721_v39 = vpack.c.bf16 %v718_v32, %v715_v28  ;;  %v765_v40 = vmul.f32 %v760_v30, %v408_v31  ;;  %v768_v42 = vmul.f32 %v760_v30, %v410_v37 }
 0x127   : > { %v770_v62 = vpack.c.bf16 %v767_v35, %v764_v57  ;;  %v821_v18 = vpack.c.bf16 %v1655_v45, %v1650_v38  ;;  %v820_v29 = vpack.c.bf16 %v1653_v41, %v1646_v34  ;;  %v1682_v43 = vmul.f32 %v1620_v20, %v408_v31  ;;  %v1226_v41 = vld [vmem:[%s1841_s4 + $0x4] ss:$8 sps:$4 sm:$0xff]  }
 0x128   : > { %v771_v44 = vpack.c.bf16 %v768_v42, %v765_v40  ;;  %v1685_v46 = vmul.f32 %v1620_v20, %v410_v37  ;;  %v1689_v0 = vmul.f32 %v1623_v2, %v1635_v26  ;;  %v1692_v30 = vmul.f32 %v1623_v2, %v409_v33  ;;  %1151 = vmatprep.mubr.msk.bf16.mxu1 %vm512_vm7, %v1226_v41 }
 0x129   : > { %608 = vrot.lane.b32.xlu1 %v601_v6, %s1335_s10  ;;  %510 = vrot.lane.b32.xlu0 %v502_v19, %s1337_s20  ;;  %v594_v20 = vmul.f32 0.0, %v1601_v58  ;;  %v666_v37 = vmul.f32 0.0, %v1603_v59  ;;  %v716_v26 = vmul.f32 0.0, %v1607_v61  ;;  %v766_v58 = vmul.f32 0.0, %v1611_v63  ;;  %v859_v63 = vld [vmem:[%s1842_s5] sm:$0xff]  ;;  %v457_v51 = vpop.permute.xlu0 %456 }
 0x12a   : > { %v636_v34 = vpack.c.bf16 %v1685_v46, %v1682_v43  ;;  %v635_v31 = vpack.c.bf16 %v1692_v30, %v1689_v0  ;;  %v816_v61 = vmul.f32 0.0, %v1616_v10  ;;  %v932_v10 = vld [vmem:[%s1844_s7] sm:$0xff] }
 0x12b   : > { %v600_v2 = vpack.c.bf16 %v594_v20, %v594_v20  ;;  %v672_v33 = vpack.c.bf16 %v666_v37, %v666_v37  ;;  %v722_v38 = vpack.c.bf16 %v716_v26, %v716_v26  ;;  %v772_v59 = vpack.c.bf16 %v766_v58, %v766_v58  ;;  %v1224_v26 = vld [vmem:[%s1841_s4] ss:$8 sps:$4 sm:$0xff]  }
 0x12c   : > { %v822_v45 = vpack.c.bf16 %v816_v61, %v816_v61 }
 0x12d   : > { %560 = vrot.lane.b32.xlu1 %v552_v23, %s1336_s12  ;;  %676 = vrot.lane.b32.xlu0 %v670_v24, %s1334_s26  ;;  %s1063_s12 = sshll.u32 %s323_s23, 4  ;;  %s1785_s12 = int_to_ptr.vmem [resolvable:$true] %s1063_s12 }
 0x12e   : > { %s1259_s15 = scalar_lea.vmem %s1785_s12, 1024  ;;  %p1266_p8 = scmp.lt.s32.totalorder %s1785_s12, %s1264_s21 }
 0x12f   : > { %p1260_p6 = scmp.ne.s32.totalorder %s1785_s12, %s1259_s15 }
 0x131   : > { %606 = vrot.lane.b32.xlu1 %v600_v2, %s1335_s10  ;;  %610 = vrot.lane.b32.xlu0 %v602_v27, %s1335_s10  ;;  %p1261_p12 = pnand %p1260_p6, %p1854_p11 }
 0x133   : > { %p1262_p13 = pneg %p1261_p12 }
 0x135   : > { %680 = vrot.lane.b32.xlu1 %v672_v33, %s1334_s26  ;;  %730 = vrot.lane.b32.xlu0 %v722_v38, %s1333_s24 }
 0x139   : > { %726 = vrot.lane.b32.xlu1 %v720_v60, %s1333_s24  ;;  %678 = vrot.lane.b32.xlu0 %v671_v36, %s1334_s26 }
 0x13b   : > { %v507_v52 = vpop.permute.xlu1 %506 }
 0x13d   : > { %728 = vrot.lane.b32.xlu1 %v721_v39, %s1333_s24  ;;  %776 = vrot.lane.b32.xlu0 %v770_v62, %s1332_s16 }
 0x13f   : > { %v557_v53 = vpop.permute.xlu0 %556 }
 0x141   : > { %780 = vrot.lane.b32.xlu1 %v772_v59, %s1332_s16  ;;  %778 = vrot.lane.b32.xlu0 %v771_v44, %s1332_s16  ;;  %s1265_s16 = scalar_lea.vmem %s1264_s21, 2048 }
 0x142   : > { %p1267_p10 = scmp.lt.s32.totalorder %s1265_s16, %s1259_s15 }
 0x144   : > { %p1268_p0 = por %p1267_p10, %p1266_p8 }
 0x145   : > { %828 = vrot.lane.b32.xlu1 %v821_v18, %s1331_s25  ;;  %830 = vrot.lane.b32.xlu0 %v822_v45, %s1331_s25 }
 0x146   : > { %p1269_p2 = pnand %p1268_p0, %p1262_p13 }
 0x149   : > { %826 = vrot.lane.b32.xlu1 %v820_v29, %s1331_s25  ;;  %863 = vperm.xlu0 %1221, %v859_v63   ;;  %s1162_s25 = sshll.u32 %s1407_s9, 10  ;;  %s1050_s9 = scalar_lea.sflag [#allocation6], %s1490_s22 }
 0x14a   : > { %s1792_s24 = scalar_lea.hbm %s1845_s8, %s1162_s25 }
 0x14d   : > { %938 = vperm.xlu0 %1221, %v932_v10   ;;  %868 = vperm.xlu1 %1222, %v860_v48  }
 0x151   : > { %948 = vperm.xlu0 %1221, %v934_v47   ;;  %943 = vperm.xlu1 %1222, %v933_v49   ;;  %v1227_v49 = vld [vmem:[%s1843_s6] sm:$0xff]  }
 0x155   : > { %953 = vperm.xlu1 %1222, %v935_v50   ;;  %v1228_v50 = vld [vmem:[%s1843_s6 + $0x8] sm:$0xff]  }
 0x193   : > { %v509_v6 = vpop.permute.xlu1 %508  ;;  %v459_v11 = vpop.permute.xlu0 %458 }
 0x194   : > { %v463_v16 = vsel %vm462_vm8, %v457_v51, %v459_v11  ;;  %v513_v55 = vsel %vm512_vm7, %v507_v52, %v509_v6 }
 0x197   : > { %v461_v12 = vpop.permute.xlu1 %460  ;;  %v559_v54 = vpop.permute.xlu0 %558 }
 0x198   : > { %v464_v15 = vsel %vm462_vm8, %v459_v11, %v461_v12  ;;  %v563_v17 = vsel %vm562_vm6, %v557_v53, %v559_v54 }
 0x199   : > { %883 = vmatprep.subr.bf16.mxu1 %v464_v15 }
 0x19a   : > { %884 = vmatpush1.bf16.msra.mxu1 %v463_v16 }
 0x19b   : > { %v609_v19 = vpop.permute.xlu1 %608  ;;  %v511_v21 = vpop.permute.xlu0 %510 }
 0x19c   : > { %v514_v22 = vsel %vm512_vm7, %v509_v6, %v511_v21 }
 0x19d   : > { %885 = vmatprep.subr.bf16.mxu1 %v514_v22 }
 0x19e   : > { %886 = vmatpush1.bf16.msra.mxu1 %v513_v55 }
 0x19f   : > { %v561_v23 = vpop.permute.xlu1 %560  ;;  %v677_v24 = vpop.permute.xlu0 %676 }
 0x1a0   : > { %v564_v25 = vsel %vm562_vm6, %v559_v54, %v561_v23 }
 0x1a1   : > { %887 = vmatprep.subr.bf16.mxu1 %v564_v25 }
 0x1a2   : > { %888 = vmatpush1.bf16.msra.mxu1 %v563_v17 }
 0x1a3   : > { %v607_v27 = vpop.permute.xlu1 %606  ;;  %v611_v56 = vpop.permute.xlu0 %610 }
 0x1a4   : > { %v614_v28 = vsel %vm612_vm5, %v609_v19, %v611_v56  ;;  %v613_v32 = vsel %vm612_vm5, %v607_v27, %v609_v19 }
 0x1a5   : > { %889 = vmatprep.subr.bf16.mxu1 %v614_v28 }
 0x1a6   : > { %890 = vmatpush1.bf16.msra.mxu1 %v613_v32 }
 0x1a7   : > { %v681_v60 = vpop.permute.xlu1 %680  ;;  %891 = vmatprep.subr.bf16.mxu1 %v636_v34  ;;  %v731_v57 = vpop.permute.xlu0 %730 }
 0x1aa   : > { %892 = vmatpush1.bf16.msra.mxu1 %v635_v31 }
 0x1ab   : > { %v727_v35 = vpop.permute.xlu1 %726  ;;  %v679_v36 = vpop.permute.xlu0 %678 }
 0x1ac   : > { %v684_v39 = vsel %vm589_vm4, %v679_v36, %v681_v60  ;;  %v683_v40 = vsel %vm589_vm4, %v677_v24, %v679_v36 }
 0x1ad   : > { %893 = vmatprep.subr.bf16.mxu1 %v684_v39 }
 0x1ae   : > { %894 = vmatpush1.bf16.msra.mxu1 %v683_v40 }
 0x1af   : > { %v729_v42 = vpop.permute.xlu1 %728  ;;  %v777_v62 = vpop.permute.xlu0 %776 }
 0x1b0   : > { %v734_v18 = vsel %vm539_vm3, %v729_v42, %v731_v57  ;;  %v733_v29 = vsel %vm539_vm3, %v727_v35, %v729_v42 }
 0x1b1   : > { %895 = vmatprep.subr.bf16.mxu1 %v734_v18 }
 0x1b2   : > { %896 = vmatpush1.bf16.msra.mxu1 %v733_v29 }
 0x1b3   : > { %v781_v43 = vpop.permute.xlu1 %780  ;;  %v779_v44 = vpop.permute.xlu0 %778 }
 0x1b4   : > { %v784_v46 = vsel %vm489_vm2, %v779_v44, %v781_v43  ;;  %v783_v0 = vsel %vm489_vm2, %v777_v62, %v779_v44 }
 0x1b5   : > { %897 = vmatprep.subr.bf16.mxu1 %v784_v46 }
 0x1b6   : > { %898 = vmatpush1.bf16.msra.mxu1 %v783_v0 }
 0x1b7   : > { %v829_v30 = vpop.permute.xlu1 %828  ;;  %v831_v34 = vpop.permute.xlu0 %830 }
 0x1b8   : > { %v834_v31 = vsel %vm439_vm1, %v829_v30, %v831_v34 }
 0x1b9   : > { %899 = vmatprep.subr.bf16.mxu1 %v834_v31 }
 0x1bb   : > { %v827_v20 = vpop.permute.xlu1 %826 }
 0x1bc   : > { %v833_v37 = vsel %vm439_vm1, %v827_v20, %v829_v30 }
 0x1bd   : > { %900 = vmatpush1.bf16.msra.mxu1 %v833_v37 }
 0x1c0   : > { %916 = vmatmul.mubr.bf16.vlgmr.msra.gmra.mrb[0].mxu1 %v1224_v26 }
 0x1c8   : > { %v864_v33 = vpop.permute.xlu0 %863 }
 0x1cc   : > { %v869_v58 = vpop.permute.xlu1 %868  ;;  %v939_v51 = vpop.permute.xlu0 %938 }
 0x1d0   : > { %v944_v11 = vpop.permute.xlu1 %943  ;;  %v949_v23 = vpop.permute.xlu0 %948 }
 0x1d4   : > { %v954_v17 = vpop.permute.xlu1 %953 }
 0x293   : > { %v917_v2 = vpop.f32.mrb[0].mxu1 }
 0x294   : > { %v919_v38 = vpop.f32.mrb[1].mxu1  ;;  %v918_v61 = vadd.f32 %v917_v2, %v864_v33 }
 0x295   : > { %v921_v59 = vpop.f32.mrb[2].mxu1  ;;  %v920_v63 = vadd.f32 %v919_v38, %v864_v33 }
 0x296   : > { %v922_v41 = vadd.f32 %v921_v59, %v869_v58  ;;  %v923_v45 = vpop.f32.mrb[3].mxu1 }
 0x297   : > { %v924_v10 = vadd.f32 %v923_v45, %v869_v58 }
 0x298   : > { %v930_v47 = vpack.c.bf16 %v922_v41, %v918_v61 }
 0x299   : > { %v931_v48 = vpack.c.bf16 %v924_v10, %v920_v63 }
 0x29b   : > { %972 = vmatprep.subr.bf16.mxu0 %v931_v48 }
 0x29c   : > { %973 = vmatpush1.bf16.msra.mxu0 %v930_v47 }
 0x29f   : > { %1154 = vmatmul.mubr.msk.bf16.vlgmr.msra.gmra.mrb[4].mxu0 %vm512_vm7, %v1227_v49 }
 0x2a0   : > { %1014 = vmatprep.mubr.bf16.mxu0 %v1330_v1 }
 0x2a7   : > { %1155 = vmatmul.mubr.msk.bf16.gmra.mrb[8].mxu0 %vm512_vm7, %v1228_v50 }
 0x372   : > { %v1006_v52 = vpop.f32.mrb[4].mxu0 }
 0x373   : > { %v1007_v53 = vadd.f32 %v1006_v52, %v939_v51  ;;  %v1008_v6 = vpop.f32.mrb[5].mxu0 }
 0x374   : > { %v1009_v12 = vadd.f32 %v1008_v6, %v939_v51  ;;  %v1010_v54 = vpop.f32.mrb[6].mxu0 }
 0x375   : > { %v1033_v15 = vadd.f32 %v1007_v53, %v1509_v5  ;;  %v1011_v16 = vadd.f32 %v1010_v54, %v944_v11  ;;  %v1012_v19 = vpop.f32.mrb[7].mxu0 }
 0x376   : > { %v1034_v21 = vadd.f32 %v1009_v12, %v1505_v3  ;;  %v1013_v1 = vadd.f32 %v1012_v19, %v944_v11 }
 0x377   : > { %1041 = vst [vmem:[%s323_s23] sm:$0xff] %v1033_v15  ;;  %v1035_v22 = vadd.f32 %v1011_v16, %v1513_v7 }
 0x378   : > { %1042 = vst [vmem:[%s323_s23 + $0x8] sm:$0xff] %v1034_v21  ;;  %v1036_v55 = vadd.f32 %v1013_v1, %v1507_v4 }
 0x379   : > { %1043 = vst [vmem:[%s323_s23 + $0x10] sm:$0xff] %v1035_v22 }
 0x37a   : > { %1044 = vst [vmem:[%s323_s23 + $0x18] sm:$0xff] %v1036_v55  ;;  %v1016_v24 = vpop.f32.mrb[8].mxu0 }
 0x37b   : > { %v1017_v25 = vadd.f32 %v1016_v24, %v949_v23  ;;  %v1018_v5 = vpop.f32.mrb[9].mxu0 }
 0x37c   : > { %v1019_v27 = vadd.f32 %v1018_v5, %v949_v23  ;;  %v1020_v3 = vpop.f32.mrb[10].mxu0 }
 0x37d   : > { %v1037_v56 = vadd.f32 %v1017_v25, %v1524_v13  ;;  %v1021_v28 = vadd.f32 %v1020_v3, %v954_v17  ;;  %v1022_v7 = vpop.f32.mrb[11].mxu0 }
 0x37e   : > { %v1038_v32 = vadd.f32 %v1019_v27, %v1515_v8  ;;  %v1023_v4 = vadd.f32 %v1022_v7, %v954_v17 }
 0x37f   : > { %1045 = vst [vmem:[%s323_s23 + $0x20] sm:$0xff] %v1037_v56  ;;  %v1039_v60 = vadd.f32 %v1021_v28, %v1526_v14 }
 0x380   : > { %1046 = vst [vmem:[%s323_s23 + $0x28] sm:$0xff] %v1038_v32  ;;  %v1040_v57 = vadd.f32 %v1023_v4, %v1517_v9 }
 0x381   : > { %1047 = vst [vmem:[%s323_s23 + $0x30] sm:$0xff] %v1039_v60 }
 0x382   : > { %1048 = vst [vmem:[%s323_s23 + $0x38] sm:$0xff] %v1040_v57 }
 0x383   : > { %1272 = shalt.err (!%p1269_p2)
}
 0x384   : > { %s1273_s19 = scalar_lea.hbm %s1792_s24, 1024  ;;  %s1277_s26 = scalar_lea.hbm %s1845_s8, 2048 }
 0x385   : > { %p1274_p4 = scmp.ne.s32.totalorder %s1792_s24, %s1273_s19  ;;  %p1278_p9 = scmp.lt.u32.totalorder %s1792_s24, %s1845_s8 }
 0x386   : > { %p1279_p1 = scmp.lt.u32.totalorder %s1277_s26, %s1273_s19  ;;  %p1281_p6 = scmp.lt.u32.totalorder %s1273_s19, %s1792_s24 }
 0x387   : > { %p1275_p5 = pnand %p1274_p4, %p1854_p11 }
 0x388   : > { %p1280_p3 = por %p1279_p1, %p1278_p9 }
 0x389   : > { %p1276_p7 = pneg %p1275_p5 }
 0x38a   : > { %p1282_p12 = por %p1281_p6, %p1280_p3 }
 0x38c   : > { %p1283_p13 = pnand %p1282_p12, %p1276_p7 }
 0x38e   : > { %1286 = shalt.err (!%p1283_p13)
}
 0x38f   : > { %s1340_s15 = smov 256  }
 0x390   : > { %1165 = dma.vmem_to_hbm [thread:$0]  (%p1854_p11), %s1785_s12, 1024, %s1792_s24, %s1050_s9, %s1340_s15, %s1340_s15, %s1337_s20  }
 0x391 PF: > { %s1078_s21 = sand.u32 1, %s1313_s27   ;;  %p1855_p8 = scmp.ne.s32.totalorder %s1851_s18, 0 }
 0x392   : > { %p1856_p10 = scmp.ge.s32.totalorder %s1325_s30, 2  ;;  %s1079_s16 = scalar_lea.sflag [#allocation6], %s1078_s21 }
 0x394   : > { %p1172_p0 = pnand %p1856_p10, %p1855_p8 }
 0x396   : > { %1308 = dma.done.wait (!%p1172_p0), %s1079_s16, 1024  }
 0x397   : > { %1310 = vsyncadd (!%p1172_p0), %s1079_s16, 4294966272  ;;  %p21_p2 = scmp.ge.s32.totalorder %s1411_s11, 4   ;;  %s1857_s27 = smov %s1317_s28 }
 0x398   : > { %s1858_s28 = smov %s1321_s29  ;;  %s1859_s29 = smov %s1423_s14 }
 0x399   : > { %s1860_s30 = smov %s1411_s11  ;;  %23 = sbr.rel (!%p21_p2) target bundleno = 5 (0x5), region = 97 }
 0x3a0   :  { %1084 = vsyncpa [#allocation5], 1 }
 0x3a1   :  { %1086 = vsyncpa [#allocation5 + $0x1], 1 }
 0x3a2   :  { %1087 = vsyncpa [#allocation6], 1 }
 0x3a3   :  { %1089 = vsyncpa [#allocation6 + $0x1], 1 }

</bundles_post_ra>
